<compile_context>
chip_gen: v7x
topology: tpu7x:2x2x1
jax: 0.10.0
libtpu: 0.0.40
codegen_flags: <defaults>
</compile_context>

<pallas_src>
import functools
import math

import numpy as np

import jax
import jax.numpy as jnp
from jax.experimental import pallas as pl
from jax.experimental.pallas import tpu as pltpu


_SQRT1_2 = 1.0 / math.sqrt(2.0)

# erf via Abramowitz & Stegun 7.1.26 (|err| < 1.5e-7), matching PyTorch's
# erf-based nn.GELU() to f32 working precision.
_ERF_P = 0.3275911
_ERF_A1 = 0.254829592
_ERF_A2 = -0.284496736
_ERF_A3 = 1.421413741
_ERF_A4 = -1.453152027
_ERF_A5 = 1.061405429


def _gelu(y):
    # gelu(y) = 0.5*y*(1 + erf(y/sqrt(2))) = 0.5*(y + |y|*erf(|y|/sqrt(2)))
    ay = jnp.abs(y)
    a = ay * _SQRT1_2
    t = pl.reciprocal(1.0 + _ERF_P * a, approx=True)       # EUP, not a VALU divide
    poly = t * (_ERF_A1 + t * (_ERF_A2 + t * (_ERF_A3 + t * (_ERF_A4 + t * _ERF_A5))))
    erf_abs = 1.0 - poly * jnp.exp(-a * a)                  # exp -> EUP
    return 0.5 * (y + ay * erf_abs)


def _banded_conv3x3(x_cd, b_ref, bias_row):
    """3x3 'same' conv + folded BN of one lane-packed image.

    x_cd    : (H, W*Cin) in the matmul (MXU) dtype.
    b_ref   : (3, W*Cin, W*Cout) Ref - banded weights, one slab per ky tap
              (kx taps, W zero-padding and BN scale folded into the band).
    bias_row: (1, W*Cout) f32 - folded conv bias + BN shift.
    Returns (H, W*Cout) f32.
    """
    H, K = x_cd.shape
    zrow = jnp.zeros((1, K), x_cd.dtype)
    xp = jnp.concatenate([zrow, x_cd, zrow], axis=0)        # 1-row halo, VMEM only
    x_above = xp[0:H]            # x[h-1]  (ky = 0 tap)
    x_below = xp[2:H + 2]        # x[h+1]  (ky = 2 tap)

    acc = jnp.dot(x_above, b_ref[0], preferred_element_type=jnp.float32)
    acc = acc + jnp.dot(x_cd, b_ref[1], preferred_element_type=jnp.float32)
    acc = acc + jnp.dot(x_below, b_ref[2], preferred_element_type=jnp.float32)
    return acc + bias_row


def _res_conv_block_kernel(x_ref, b1_ref, c1_ref, b2_ref, c2_ref, o_ref, *,
                           same_channels, res_scale):
    cdt = b1_ref.dtype                                      # matmul (MXU) dtype
    x = x_ref[...]                                          # (H, W*Cin), already cdt

    y1 = _gelu(_banded_conv3x3(x, b1_ref, c1_ref[...]))     # conv1+BN1+GELU (f32)
    x1 = y1.astype(cdt)                                     # single downcast for MXU
    x2 = _gelu(_banded_conv3x3(x1, b2_ref, c2_ref[...]))    # conv2+BN2+GELU (f32)

    res = x.astype(jnp.float32) if same_channels else y1    # residual, in-kernel
    o_ref[...] = ((res + x2) * res_scale).astype(o_ref.dtype)   # lane-dense store


def res_conv_block_fused(x_packed, b1, c1, b2, c2, *, same_channels):
    """x_packed: (N, H, W*Cin); b1: (3, W*Cin, W*Cout); b2: (3, W*Cout, W*Cout);
    c1/c2: (1, W*Cout) f32.  Returns lane-packed (N, H, W*Cout) float32."""
    N, H, K1 = x_packed.shape
    Nl = b1.shape[-1]

    kernel = functools.partial(_res_conv_block_kernel,
                               same_channels=same_channels,
                               res_scale=_SQRT1_2)

    return pl.pallas_call(
        kernel,
        out_shape=jax.ShapeDtypeStruct((N, H, Nl), jnp.float32),
        grid_spec=pltpu.PrefetchScalarGridSpec(
            num_scalar_prefetch=0,
            grid=(N,),                                       # one image per step
            in_specs=[
                pl.BlockSpec((None, H, K1), lambda n: (n, 0, 0)),   # squeezed batch
                pl.BlockSpec((3, K1, Nl), lambda n: (0, 0, 0)),     # conv1 bands
                pl.BlockSpec((1, Nl), lambda n: (0, 0)),            # conv1 bias
                pl.BlockSpec((3, Nl, Nl), lambda n: (0, 0, 0)),     # conv2 bands
                pl.BlockSpec((1, Nl), lambda n: (0, 0)),            # conv2 bias
            ],
            out_specs=pl.BlockSpec((None, H, Nl), lambda n: (n, 0, 0)),
        ),
        compiler_params=pltpu.CompilerParams(
            dimension_semantics=("parallel",),               # 2 TCs on v7x for N=2
            vmem_limit_bytes=32 * 1024 * 1024,
        ),
    )(x_packed, b1, c1, b2, c2)


class ResConvBlockPallas:
    BN_EPS = 1e-5

    def __init__(self, key, in_channels, out_channels, compute_dtype=jnp.bfloat16):
        self.in_channels = in_channels
        self.out_channels = out_channels
        self.compute_dtype = compute_dtype

        def make_conv_bn(k, cin, cout):
            kw, kb, kg, kbe, km, kv = jax.random.split(k, 6)
            w = jax.random.normal(kw, (3, 3, cin, cout), jnp.float32) * 0.1   # HWIO
            b = jax.random.normal(kb, (cout,), jnp.float32) * 0.05
            gamma = 1.0 + 0.1 * jax.random.normal(kg, (cout,), jnp.float32)
            beta = 0.05 * jax.random.normal(kbe, (cout,), jnp.float32)
            mean = 0.02 * jax.random.normal(km, (cout,), jnp.float32)
            var = 1.0 + 0.1 * jax.random.uniform(kv, (cout,), jnp.float32)
            return dict(w=w, b=b, gamma=gamma, beta=beta, mean=mean, var=var)

        k1, k2 = jax.random.split(key)
        self.p1 = make_conv_bn(k1, in_channels, out_channels)
        self.p2 = make_conv_bn(k2, out_channels, out_channels)

    def _banded(self, p, W):
        """Fold eval-mode BN into the conv and build per-ky banded weight slabs."""
        scale = p["gamma"] / jnp.sqrt(p["var"] + self.BN_EPS)          # (Cout,)
        bias = p["beta"] + scale * (p["b"] - p["mean"])                # (Cout,)
        wsc = p["w"] * scale[None, None, None, :]                      # (3,3,Cin,Cout)
        cin, cout = p["w"].shape[2], p["w"].shape[3]

        bands = []
        for ky in range(3):
            b = jnp.zeros((W * cin, W * cout), jnp.float32)
            for kx in range(3):
                # tap (ky, kx) lives on the block-band w' = w + kx - 1
                b = b + jnp.kron(jnp.eye(W, k=1 - kx, dtype=jnp.float32), wsc[ky, kx])
            bands.append(b)
        banded = jnp.stack(bands, axis=0).astype(self.compute_dtype)   # (3,W*Cin,W*Cout)
        bias_row = jnp.tile(bias, W).reshape(1, W * cout)              # lane-packed bias
        return banded, bias_row

    def __call__(self, x_nchw):
        N, C, H, W = x_nchw.shape
        assert C == self.in_channels
        cin, cout = self.in_channels, self.out_channels

        # NCHW -> lane-packed (N, H, W*Cin); the reshape after transpose is layout-free.
        x_packed = jnp.transpose(x_nchw, (0, 2, 3, 1)).reshape(N, H, W * cin)
        x_packed = x_packed.astype(self.compute_dtype)       # bf16 halves HBM bytes

        b1, c1 = self._banded(self.p1, W)
        b2, c2 = self._banded(self.p2, W)

        out_packed = res_conv_block_fused(x_packed, b1, c1, b2, c2,
                                          same_channels=(cin == cout))
        return jnp.transpose(out_packed.reshape(N, H, W, cout), (0, 3, 1, 2))

    # pure-JAX reference (same semantics) for correctness checking
    def reference(self, x_nchw):
        x = jnp.transpose(x_nchw, (0, 2, 3, 1))

        def block(xin, p):
            y = jax.lax.conv_general_dilated(
                xin, p["w"], window_strides=(1, 1), padding="SAME",
                dimension_numbers=("NHWC", "HWIO", "NHWC"),
                precision=jax.lax.Precision.HIGHEST) + p["b"]
            y = p["gamma"] * (y - p["mean"]) / jnp.sqrt(p["var"] + self.BN_EPS) + p["beta"]
            return 0.5 * y * (1.0 + jax.scipy.special.erf(y * _SQRT1_2))

        x1 = block(x, self.p1)
        x2 = block(x1, self.p2)
        res = x if self.in_channels == self.out_channels else x1
        out = (res + x2) * _SQRT1_2
        return jnp.transpose(out, (0, 3, 1, 2))


if __name__ == "__main__":
    key = jax.random.PRNGKey(0)
    kx, kp1, kp2 = jax.random.split(key, 3)
    N, H, W = 2, 16, 16

    x = jax.random.normal(kx, (N, 4, H, W), jnp.float32)

    # case 1: in_channels != out_channels (residual = x1), bf16 MXU fast path
    blk_a = ResConvBlockPallas(kp1, in_channels=4, out_channels=8)
    out_a = jax.block_until_ready(blk_a(x))
    ref_a = jax.block_until_ready(blk_a.reference(x))
    np.testing.assert_allclose(np.asarray(out_a), np.asarray(ref_a),
                               rtol=2e-2, atol=2e-2)

    # case 2: in_channels == out_channels (residual = x), bf16 MXU fast path
    blk_b = ResConvBlockPallas(kp2, in_channels=4, out_channels=4)
    out_b = jax.block_until_ready(blk_b(x))
    ref_b = jax.block_until_ready(blk_b.reference(x))
    np.testing.assert_allclose(np.asarray(out_b), np.asarray(ref_b),
                               rtol=2e-2, atol=2e-2)

    # case 3: f32 MXU operands -> validate against a tighter bound
    blk_c = ResConvBlockPallas(kp1, in_channels=4, out_channels=8,
                               compute_dtype=jnp.float32)
    out_c = jax.block_until_ready(blk_c(x))
    ref_c = jax.block_until_ready(blk_c.reference(x))
    np.testing.assert_allclose(np.asarray(out_c), np.asarray(ref_c),
                               rtol=5e-3, atol=5e-3)

    assert out_a.shape == (N, 8, H, W) and out_b.shape == (N, 4, H, W)
    print("KERNEL_OK")
</pallas_src>

<mosaic_0001>
module attributes {stable_mosaic.version = 11 : i64} {
  func.func @_res_conv_block_kernel(%arg0: i32, %arg1: memref<1x16x64xbf16, #tpu.memory_space<vmem>>, %arg2: memref<3x64x128xbf16, #tpu.memory_space<vmem>>, %arg3: memref<1x128xf32, #tpu.memory_space<vmem>>, %arg4: memref<3x128x128xbf16, #tpu.memory_space<vmem>>, %arg5: memref<1x128xf32, #tpu.memory_space<vmem>>, %arg6: memref<1x16x128xf32, #tpu.memory_space<vmem>>) attributes {dimension_semantics = [#tpu.dimension_semantics<parallel>], iteration_bounds = array<i64: 2>, scalar_prefetch = 0 : i64, scratch_operands = 0 : i64, tpu.core_type = #tpu.core_type<tc>, window_params = [{transform_indices = @transform_0, window_bounds = array<i64: 1, 16, 64>}, {pipeline_mode = #tpu.pipeline_mode<synchronous>, transform_indices = @transform_1, window_bounds = array<i64: 3, 64, 128>}, {pipeline_mode = #tpu.pipeline_mode<synchronous>, transform_indices = @transform_2, window_bounds = array<i64: 1, 128>}, {pipeline_mode = #tpu.pipeline_mode<synchronous>, transform_indices = @transform_3, window_bounds = array<i64: 3, 128, 128>}, {pipeline_mode = #tpu.pipeline_mode<synchronous>, transform_indices = @transform_4, window_bounds = array<i64: 1, 128>}, {transform_indices = @transform_5, window_bounds = array<i64: 1, 16, 128>}]} {
    %c0 = arith.constant 0 : index
    %c0_0 = arith.constant 0 : index
    %c0_1 = arith.constant 0 : index
    %0 = vector.load %arg1[%c0, %c0_0, %c0_1] : memref<1x16x64xbf16, #tpu.memory_space<vmem>>, vector<1x16x64xbf16>
    %1 = vector.shape_cast %0 : vector<1x16x64xbf16> to vector<16x64xbf16>
    %c0_2 = arith.constant 0 : index
    %c0_3 = arith.constant 0 : index
    %2 = vector.load %arg3[%c0_2, %c0_3] : memref<1x128xf32, #tpu.memory_space<vmem>>, vector<1x128xf32>
    %cst = arith.constant 0.000000e+00 : bf16
    %3 = vector.broadcast %cst : bf16 to vector<1x64xbf16>
    %4 = tpu.concatenate %3, %1, %3 in 0 : vector<1x64xbf16>, vector<16x64xbf16>, vector<1x64xbf16> -> vector<18x64xbf16>
    %5 = vector.extract_strided_slice %4 {offsets = [0, 0], sizes = [16, 64], strides = [1, 1]} : vector<18x64xbf16> to vector<16x64xbf16>
    %6 = vector.extract_strided_slice %4 {offsets = [2, 0], sizes = [16, 64], strides = [1, 1]} : vector<18x64xbf16> to vector<16x64xbf16>
    %c0_4 = arith.constant 0 : index
    %c0_5 = arith.constant 0 : index
    %c0_6 = arith.constant 0 : index
    %7 = vector.load %arg2[%c0_4, %c0_5, %c0_6] : memref<3x64x128xbf16, #tpu.memory_space<vmem>>, vector<1x64x128xbf16>
    %8 = vector.shape_cast %7 : vector<1x64x128xbf16> to vector<64x128xbf16>
    %cst_7 = arith.constant dense<0.000000e+00> : vector<16x128xf32>
    %9 = tpu.matmul %5, %8, %cst_7 {dimension_numbers = #tpu.dot_dimension_numbers<[1], [0], [0], [1], [0, 0, 1, 1], [], []>} : vector<16x64xbf16>, vector<64x128xbf16>, vector<16x128xf32> -> vector<16x128xf32>
    %c1 = arith.constant 1 : index
    %c0_8 = arith.constant 0 : index
    %c0_9 = arith.constant 0 : index
    %10 = vector.load %arg2[%c1, %c0_8, %c0_9] : memref<3x64x128xbf16, #tpu.memory_space<vmem>>, vector<1x64x128xbf16>
    %11 = vector.shape_cast %10 : vector<1x64x128xbf16> to vector<64x128xbf16>
    %cst_10 = arith.constant dense<0.000000e+00> : vector<16x128xf32>
    %12 = tpu.matmul %1, %11, %cst_10 {dimension_numbers = #tpu.dot_dimension_numbers<[1], [0], [0], [1], [0, 0, 1, 1], [], []>} : vector<16x64xbf16>, vector<64x128xbf16>, vector<16x128xf32> -> vector<16x128xf32>
    %13 = arith.addf %9, %12 : vector<16x128xf32>
    %c2 = arith.constant 2 : index
    %c0_11 = arith.constant 0 : index
    %c0_12 = arith.constant 0 : index
    %14 = vector.load %arg2[%c2, %c0_11, %c0_12] : memref<3x64x128xbf16, #tpu.memory_space<vmem>>, vector<1x64x128xbf16>
    %15 = vector.shape_cast %14 : vector<1x64x128xbf16> to vector<64x128xbf16>
    %cst_13 = arith.constant dense<0.000000e+00> : vector<16x128xf32>
    %16 = tpu.matmul %6, %15, %cst_13 {dimension_numbers = #tpu.dot_dimension_numbers<[1], [0], [0], [1], [0, 0, 1, 1], [], []>} : vector<16x64xbf16>, vector<64x128xbf16>, vector<16x128xf32> -> vector<16x128xf32>
    %17 = arith.addf %13, %16 : vector<16x128xf32>
    %18 = vector.broadcast %2 : vector<1x128xf32> to vector<16x128xf32>
    %19 = arith.addf %17, %18 : vector<16x128xf32>
    %20 = math.absf %19 : vector<16x128xf32>
    %cst_14 = arith.constant 0.707106769 : f32
    %21 = vector.broadcast %cst_14 : f32 to vector<16x128xf32>
    %22 = arith.mulf %20, %21 : vector<16x128xf32>
    %cst_15 = arith.constant 0.327591091 : f32
    %23 = vector.broadcast %cst_15 : f32 to vector<16x128xf32>
    %24 = arith.mulf %23, %22 : vector<16x128xf32>
    %cst_16 = arith.constant 1.000000e+00 : f32
    %25 = vector.broadcast %cst_16 : f32 to vector<16x128xf32>
    %26 = arith.addf %25, %24 : vector<16x128xf32>
    %27 = tpu.reciprocal %26 {approx = true} : vector<16x128xf32> -> vector<16x128xf32>
    %cst_17 = arith.constant 1.06140542 : f32
    %28 = vector.broadcast %cst_17 : f32 to vector<16x128xf32>
    %29 = arith.mulf %27, %28 : vector<16x128xf32>
    %cst_18 = arith.constant -1.45315206 : f32
    %30 = vector.broadcast %cst_18 : f32 to vector<16x128xf32>
    %31 = arith.addf %30, %29 : vector<16x128xf32>
    %32 = arith.mulf %27, %31 : vector<16x128xf32>
    %cst_19 = arith.constant 1.42141378 : f32
    %33 = vector.broadcast %cst_19 : f32 to vector<16x128xf32>
    %34 = arith.addf %33, %32 : vector<16x128xf32>
    %35 = arith.mulf %27, %34 : vector<16x128xf32>
    %cst_20 = arith.constant -0.284496725 : f32
    %36 = vector.broadcast %cst_20 : f32 to vector<16x128xf32>
    %37 = arith.addf %36, %35 : vector<16x128xf32>
    %38 = arith.mulf %27, %37 : vector<16x128xf32>
    %cst_21 = arith.constant 0.254829586 : f32
    %39 = vector.broadcast %cst_21 : f32 to vector<16x128xf32>
    %40 = arith.addf %39, %38 : vector<16x128xf32>
    %41 = arith.mulf %27, %40 : vector<16x128xf32>
    %cst_22 = arith.constant 0.000000e+00 : f32
    %42 = vector.broadcast %cst_22 : f32 to vector<16x128xf32>
    %43 = arith.subf %42, %22 : vector<16x128xf32>
    %44 = arith.mulf %43, %22 : vector<16x128xf32>
    %45 = math.exp %44 : vector<16x128xf32>
    %46 = arith.mulf %41, %45 : vector<16x128xf32>
    %cst_23 = arith.constant 1.000000e+00 : f32
    %47 = vector.broadcast %cst_23 : f32 to vector<16x128xf32>
    %48 = arith.subf %47, %46 : vector<16x128xf32>
    %49 = arith.mulf %20, %48 : vector<16x128xf32>
    %50 = arith.addf %19, %49 : vector<16x128xf32>
    %cst_24 = arith.constant 5.000000e-01 : f32
    %51 = vector.broadcast %cst_24 : f32 to vector<16x128xf32>
    %52 = arith.mulf %51, %50 : vector<16x128xf32>
    %53 = arith.truncf %52 : vector<16x128xf32> to vector<16x128xbf16>
    %c0_25 = arith.constant 0 : index
    %c0_26 = arith.constant 0 : index
    %54 = vector.load %arg5[%c0_25, %c0_26] : memref<1x128xf32, #tpu.memory_space<vmem>>, vector<1x128xf32>
    %cst_27 = arith.constant 0.000000e+00 : bf16
    %55 = vector.broadcast %cst_27 : bf16 to vector<1x128xbf16>
    %56 = tpu.concatenate %55, %53, %55 in 0 : vector<1x128xbf16>, vector<16x128xbf16>, vector<1x128xbf16> -> vector<18x128xbf16>
    %57 = vector.extract_strided_slice %56 {offsets = [0, 0], sizes = [16, 128], strides = [1, 1]} : vector<18x128xbf16> to vector<16x128xbf16>
    %58 = vector.extract_strided_slice %56 {offsets = [2, 0], sizes = [16, 128], strides = [1, 1]} : vector<18x128xbf16> to vector<16x128xbf16>
    %c0_28 = arith.constant 0 : index
    %c0_29 = arith.constant 0 : index
    %c0_30 = arith.constant 0 : index
    %59 = vector.load %arg4[%c0_28, %c0_29, %c0_30] : memref<3x128x128xbf16, #tpu.memory_space<vmem>>, vector<1x128x128xbf16>
    %60 = vector.shape_cast %59 : vector<1x128x128xbf16> to vector<128x128xbf16>
    %cst_31 = arith.constant dense<0.000000e+00> : vector<16x128xf32>
    %61 = tpu.matmul %57, %60, %cst_31 {dimension_numbers = #tpu.dot_dimension_numbers<[1], [0], [0], [1], [0, 0, 1, 1], [], []>} : vector<16x128xbf16>, vector<128x128xbf16>, vector<16x128xf32> -> vector<16x128xf32>
    %c1_32 = arith.constant 1 : index
    %c0_33 = arith.constant 0 : index
    %c0_34 = arith.constant 0 : index
    %62 = vector.load %arg4[%c1_32, %c0_33, %c0_34] : memref<3x128x128xbf16, #tpu.memory_space<vmem>>, vector<1x128x128xbf16>
    %63 = vector.shape_cast %62 : vector<1x128x128xbf16> to vector<128x128xbf16>
    %cst_35 = arith.constant dense<0.000000e+00> : vector<16x128xf32>
    %64 = tpu.matmul %53, %63, %cst_35 {dimension_numbers = #tpu.dot_dimension_numbers<[1], [0], [0], [1], [0, 0, 1, 1], [], []>} : vector<16x128xbf16>, vector<128x128xbf16>, vector<16x128xf32> -> vector<16x128xf32>
    %65 = arith.addf %61, %64 : vector<16x128xf32>
    %c2_36 = arith.constant 2 : index
    %c0_37 = arith.constant 0 : index
    %c0_38 = arith.constant 0 : index
    %66 = vector.load %arg4[%c2_36, %c0_37, %c0_38] : memref<3x128x128xbf16, #tpu.memory_space<vmem>>, vector<1x128x128xbf16>
    %67 = vector.shape_cast %66 : vector<1x128x128xbf16> to vector<128x128xbf16>
    %cst_39 = arith.constant dense<0.000000e+00> : vector<16x128xf32>
    %68 = tpu.matmul %58, %67, %cst_39 {dimension_numbers = #tpu.dot_dimension_numbers<[1], [0], [0], [1], [0, 0, 1, 1], [], []>} : vector<16x128xbf16>, vector<128x128xbf16>, vector<16x128xf32> -> vector<16x128xf32>
    %69 = arith.addf %65, %68 : vector<16x128xf32>
    %70 = vector.broadcast %54 : vector<1x128xf32> to vector<16x128xf32>
    %71 = arith.addf %69, %70 : vector<16x128xf32>
    %72 = math.absf %71 : vector<16x128xf32>
    %cst_40 = arith.constant 0.707106769 : f32
    %73 = vector.broadcast %cst_40 : f32 to vector<16x128xf32>
    %74 = arith.mulf %72, %73 : vector<16x128xf32>
    %cst_41 = arith.constant 0.327591091 : f32
    %75 = vector.broadcast %cst_41 : f32 to vector<16x128xf32>
    %76 = arith.mulf %75, %74 : vector<16x128xf32>
    %cst_42 = arith.constant 1.000000e+00 : f32
    %77 = vector.broadcast %cst_42 : f32 to vector<16x128xf32>
    %78 = arith.addf %77, %76 : vector<16x128xf32>
    %79 = tpu.reciprocal %78 {approx = true} : vector<16x128xf32> -> vector<16x128xf32>
    %cst_43 = arith.constant 1.06140542 : f32
    %80 = vector.broadcast %cst_43 : f32 to vector<16x128xf32>
    %81 = arith.mulf %79, %80 : vector<16x128xf32>
    %cst_44 = arith.constant -1.45315206 : f32
    %82 = vector.broadcast %cst_44 : f32 to vector<16x128xf32>
    %83 = arith.addf %82, %81 : vector<16x128xf32>
    %84 = arith.mulf %79, %83 : vector<16x128xf32>
    %cst_45 = arith.constant 1.42141378 : f32
    %85 = vector.broadcast %cst_45 : f32 to vector<16x128xf32>
    %86 = arith.addf %85, %84 : vector<16x128xf32>
    %87 = arith.mulf %79, %86 : vector<16x128xf32>
    %cst_46 = arith.constant -0.284496725 : f32
    %88 = vector.broadcast %cst_46 : f32 to vector<16x128xf32>
    %89 = arith.addf %88, %87 : vector<16x128xf32>
    %90 = arith.mulf %79, %89 : vector<16x128xf32>
    %cst_47 = arith.constant 0.254829586 : f32
    %91 = vector.broadcast %cst_47 : f32 to vector<16x128xf32>
    %92 = arith.addf %91, %90 : vector<16x128xf32>
    %93 = arith.mulf %79, %92 : vector<16x128xf32>
    %cst_48 = arith.constant 0.000000e+00 : f32
    %94 = vector.broadcast %cst_48 : f32 to vector<16x128xf32>
    %95 = arith.subf %94, %74 : vector<16x128xf32>
    %96 = arith.mulf %95, %74 : vector<16x128xf32>
    %97 = math.exp %96 : vector<16x128xf32>
    %98 = arith.mulf %93, %97 : vector<16x128xf32>
    %cst_49 = arith.constant 1.000000e+00 : f32
    %99 = vector.broadcast %cst_49 : f32 to vector<16x128xf32>
    %100 = arith.subf %99, %98 : vector<16x128xf32>
    %101 = arith.mulf %72, %100 : vector<16x128xf32>
    %102 = arith.addf %71, %101 : vector<16x128xf32>
    %cst_50 = arith.constant 5.000000e-01 : f32
    %103 = vector.broadcast %cst_50 : f32 to vector<16x128xf32>
    %104 = arith.mulf %103, %102 : vector<16x128xf32>
    %105 = arith.addf %52, %104 : vector<16x128xf32>
    %cst_51 = arith.constant 0.707106769 : f32
    %106 = vector.broadcast %cst_51 : f32 to vector<16x128xf32>
    %107 = arith.mulf %105, %106 : vector<16x128xf32>
    %c0_52 = arith.constant 0 : index
    %c0_53 = arith.constant 0 : index
    %c0_54 = arith.constant 0 : index
    %108 = vector.load %arg6[%c0_52, %c0_53, %c0_54] : memref<1x16x128xf32, #tpu.memory_space<vmem>>, vector<1x16x128xf32>
    %109 = vector.shape_cast %108 : vector<1x16x128xf32> to vector<16x128xf32>
    %110 = vector.shape_cast %107 : vector<16x128xf32> to vector<1x16x128xf32>
    tpu.vector_store %arg6[%c0_52, %c0_53, %c0_54], %110 {strides = array<i32>} : memref<1x16x128xf32, #tpu.memory_space<vmem>>, vector<1x16x128xf32>,
    return
  }
  func.func @transform_0(%arg0: i32) -> (i32, i32, i32) {
    %c0_i32 = arith.constant 0 : i32
    %c0_i32_0 = arith.constant 0 : i32
    %c0_i32_1 = arith.constant 0 : i32
    return %arg0, %c0_i32, %c0_i32_0 : i32, i32, i32
  }
  func.func @transform_1(%arg0: i32) -> (i32, i32, i32) {
    %c0_i32 = arith.constant 0 : i32
    %c0_i32_0 = arith.constant 0 : i32
    %c0_i32_1 = arith.constant 0 : i32
    %c0_i32_2 = arith.constant 0 : i32
    return %c0_i32, %c0_i32_0, %c0_i32_1 : i32, i32, i32
  }
  func.func @transform_2(%arg0: i32) -> (i32, i32) {
    %c0_i32 = arith.constant 0 : i32
    %c0_i32_0 = arith.constant 0 : i32
    %c0_i32_1 = arith.constant 0 : i32
    return %c0_i32, %c0_i32_0 : i32, i32
  }
  func.func @transform_3(%arg0: i32) -> (i32, i32, i32) {
    %c0_i32 = arith.constant 0 : i32
    %c0_i32_0 = arith.constant 0 : i32
    %c0_i32_1 = arith.constant 0 : i32
    %c0_i32_2 = arith.constant 0 : i32
    return %c0_i32, %c0_i32_0, %c0_i32_1 : i32, i32, i32
  }
  func.func @transform_4(%arg0: i32) -> (i32, i32) {
    %c0_i32 = arith.constant 0 : i32
    %c0_i32_0 = arith.constant 0 : i32
    %c0_i32_1 = arith.constant 0 : i32
    return %c0_i32, %c0_i32_0 : i32, i32
  }
  func.func @transform_5(%arg0: i32) -> (i32, i32, i32) {
    %c0_i32 = arith.constant 0 : i32
    %c0_i32_0 = arith.constant 0 : i32
    %c0_i32_1 = arith.constant 0 : i32
    return %arg0, %c0_i32, %c0_i32_0 : i32, i32, i32
  }
}

</mosaic_0001>

<bundles_post_ra>
// kernel: tpu_custom_call.1
= control target key start
LH: loop header
LB: loop body
LE: loop exit
PB: predicated region body
PF: predicated region fallthrough
CT: control target
= control target key end

     0   :  { %10 = vsyncpa [#allocation3], 0  ;;  %s1939_s0 = inlined_call_operand.hbm [shape: bf16[2,16,64], index: 0, kind: input, shape index: {}]   ;;  %s1940_s1 = inlined_call_operand.hbm [shape: bf16[3,64,128], index: 1, kind: input, shape index: {}]   ;;  %s1941_s2 = inlined_call_operand.vmem [shape: f32[1,128], index: 2, kind: input, shape index: {}]   ;;  %s1942_s3 = inlined_call_operand.hbm [shape: bf16[3,128,128], index: 3, kind: input, shape index: {}]   ;;  %s1943_s4 = inlined_call_operand.vmem [shape: f32[1,128], index: 4, kind: input, shape index: {}]   ;;  %s1944_s5 = inlined_call_operand.hbm [shape: f32[2,16,128], index: 5, kind: output, shape index: {}]  }
   0x1   :  { %12 = vsyncpa [#allocation3 + $0x1], 0 }
   0x2   :  { %13 = vsyncpa [#allocation6], 0 }
   0x3   :  { %14 = vsyncpa [#allocation4], 0 }
   0x4   :  { %16 = vsyncpa [#allocation4 + $0x1], 0  ;;  %s1615_s18 = smov 0   ;;  %s1617_s19 = smov 0  }
   0x5   :  { %s1619_s20 = smov 0   ;;  %s1621_s21 = smov 0  }
   0x6 LB: > { %s1636_s22 = sadd.s32 4294967295, %s1573_s21   ;;  %s1091_s23 = sadd.s32 4294967294, %s1573_s21   ;;  %s1573_s21 = sphi %s1621_s21, %s1966_s21   ;;  %s1569_s20 = sphi %s1619_s20, %s1965_s20   ;;  %s1565_s19 = sphi %s1617_s19, %s1964_s19   ;;  %s1561_s18 = sphi %s1615_s18, %s1963_s18  }
   0x7   : > { %p42_p0 = scmp.ne.s32.totalorder %s1565_s19, %s1561_s18  ;;  %p1945_p1 = scmp.eq.s32.totalorder %s1636_s22, 0 }
   0x8   : > { %p156_p3 = scmp.eq.s32.totalorder %s1091_s23, 1  ;;  %p1092_p5 = scmp.ge.s32.totalorder %s1573_s21, 1 }
   0x9   : > { %p1645_p4 = por %p1945_p1, %p42_p0  ;;  %p163_p7 = scmp.lt.s32.totalorder %s1573_s21, 3 }
   0xa   : > { %p1650_p6 = por %p156_p3, %p42_p0  ;;  %s1575_s27 = smov [#allocation5]  }
   0xb   : > { %s1948_s24 = scalar_select %p1645_p4, 1, 0 }
   0xc   : > { %s1949_s25 = scalar_select %p1650_p6, 1, 0 }
   0xd   : > { %p1655_p8 = pnand %p1092_p5, %p163_p7  ;;  %s175_s28 = sshll.u32 %s1575_s27, 4  ;;  %s1659_s28 = int_to_ptr.vmem [resolvable:$true] %s175_s28 }
   0xe   : > { %s1576_s30 = smov [#allocation7]   ;;  %s1417_s9 = scalar_lea.hbm %s1940_s1, 1536 }
   0xf   : > { %p1303_p9 = pneg %p1655_p8  ;;  %s191_s6 = sshll.u32 %s1576_s30, 4  ;;  %s1670_s6 = int_to_ptr.vmem [resolvable:$true] %s191_s6 }
  0x10   : > { %p1418_p12 = scmp.ne.s32.totalorder %s1940_s1, %s1417_s9  ;;  %p1424_p5 = scmp.lt.u32.totalorder %s1417_s9, %s1940_s1 }
  0x11   : > { %p1666_p11 = pnand %p1303_p9, %p1945_p1 }
  0x13   : > { %p1419_p13 = pneg %p1666_p11 }
  0x15   : > { %p1420_p0 = pnand %p1419_p13, %p1418_p12 }
  0x17   : > { %p1421_p3 = pneg %p1420_p0 }
  0x19   : > { %p1426_p7 = pnand %p1424_p5, %p1421_p3 }
  0x1b   : > { %1429 = shalt.err (!%p1426_p7)
}
  0x1c   : > { %s1430_s14 = scalar_lea.vmem %s1659_s28, 1536  ;;  %p1438_p2 = scmp.lt.s32.totalorder %s1659_s28, %s1659_s28 }
  0x1d   : > { %p1431_p9 = scmp.ne.s32.totalorder %s1659_s28, %s1430_s14  ;;  %p1439_p12 = scmp.lt.s32.totalorder %s1430_s14, %s1430_s14 }
  0x1f   : > { %p1433_p10 = pnand %p1431_p9, %p1419_p13  ;;  %p1440_p0 = por %p1439_p12, %p1438_p2 }
  0x21   : > { %p1434_p1 = pneg %p1433_p10 }
  0x23   : > { %p1441_p6 = pnand %p1440_p0, %p1434_p1 }
  0x25   : > { %1444 = shalt.err (!%p1441_p6)
}
  0x26   : > { %s1577_s15 = smov 64   ;;  %s1578_s16 = smov 4  }
  0x27   : > { %1306 = dma.hbm_to_vmem [thread:$0]  (!%p1666_p11), %s1940_s1, 1536, %s1659_s28, [#allocation6], %s1577_s15, %s1577_s15, %s1578_s16  }
  0x28   : > { %s1445_s7 = scalar_lea.hbm %s1942_s3, 3072 }
  0x29   : > { %p1446_p1 = scmp.ne.s32.totalorder %s1942_s3, %s1445_s7  ;;  %p1452_p10 = scmp.lt.u32.totalorder %s1445_s7, %s1942_s3 }
  0x2b   : > { %p1448_p2 = pnand %p1446_p1, %p1419_p13 }
  0x2d   : > { %p1449_p6 = pneg %p1448_p2 }
  0x2f   : > { %p1454_p3 = pnand %p1452_p10, %p1449_p6 }
  0x31   : > { %1457 = shalt.err (!%p1454_p3)
}
  0x32   : > { %s1458_s28 = scalar_lea.vmem %s1670_s6, 3072  ;;  %p1466_p12 = scmp.lt.s32.totalorder %s1670_s6, %s1670_s6 }
  0x33   : > { %p1459_p5 = scmp.ne.s32.totalorder %s1670_s6, %s1458_s28  ;;  %p1467_p0 = scmp.lt.s32.totalorder %s1458_s28, %s1458_s28 }
  0x35   : > { %p1461_p7 = pnand %p1459_p5, %p1419_p13  ;;  %p1468_p1 = por %p1467_p0, %p1466_p12 }
  0x37   : > { %p1462_p9 = pneg %p1461_p7 }
  0x39   : > { %p1469_p2 = pnand %p1468_p1, %p1462_p9 }
  0x3b   : > { %1472 = shalt.err (!%p1469_p2)
}
  0x3c   : > { %1309 = dma.hbm_to_vmem [thread:$0]  (!%p1666_p11), %s1942_s3, 3072, %s1670_s6, [#allocation6], %s1577_s15, %s1577_s15, %s1578_s16  }
  0x3d   : > { %s1731_s29 = sadd.s32 1, %s1573_s21   ;;  %s29_s14 = sadd.s32 1, %s1569_s20 }
  0x3e   : > { %s26_s17 = ssub.s32 %s1573_s21, %s1731_s29  ;;  %p36_p13 = scmp.ne.s32.totalorder %s1569_s20, %s1565_s19 }
  0x3f   : > { %p27_p6 = scmp.eq.s32.totalorder %s26_s17, 0  ;;  %p37_p10 = scmp.eq.s32.totalorder %s1573_s21, 0 }
  0x40   : > { %p1952_p3 = scmp.eq.s32.totalorder %s1636_s22, 1  ;;  %p1320_p7 = scmp.lt.s32.totalorder %s1573_s21, 2 }
  0x41   : > { %s1747_s27 = scalar_select %p27_p6, %s1569_s20, %s29_s14  }
  0x42   : > { %p1741_p5 = por %p1952_p3, %p36_p13  ;;  %p38_p9 = por %p37_p10, %p36_p13 }
  0x43   : > { %s208_s30 = sand.u32 1, %s1569_s20   ;;  %s1151_s6 = sshll.u32 %s1573_s21, 7 }
  0x44   : > { %s1953_s23 = scalar_select %p1741_p5, 1, 0 }
  0x45   : > { %s1096_s7 = sshll.u32 %s208_s30, 3  ;;  %s1754_s10 = scalar_lea.hbm %s1939_s0, %s1151_s6 }
  0x46   : > { %s212_s11 = scalar_lea.vmem [#allocation2], %s1096_s7  ;;  %p1758_p11 = pnand %p1320_p7, %p38_p9 }
  0x47   : > { %s219_s28 = sshll.u32 %s212_s11, 4  ;;  %s1762_s13 = scalar_lea.sflag [#allocation3], %s208_s30  ;;  %s1756_s28 = int_to_ptr.vmem [resolvable:$true] %s219_s28 }
  0x48   : > { %s1473_s14 = scalar_lea.hbm %s1754_s10, 128  ;;  %p1475_p0 = pneg %p1758_p11 }
  0x49   : > { %p1474_p12 = scmp.ne.s32.totalorder %s1754_s10, %s1473_s14  ;;  %s1478_s6 = scalar_lea.hbm %s1939_s0, 256 }
  0x4a   : > { %p1479_p13 = scmp.lt.u32.totalorder %s1754_s10, %s1939_s0  ;;  %p1480_p6 = scmp.lt.u32.totalorder %s1478_s6, %s1473_s14 }
  0x4b   : > { %p1476_p1 = pnand %p1475_p0, %p1474_p12  ;;  %p1482_p3 = scmp.lt.u32.totalorder %s1473_s14, %s1754_s10 }
  0x4c   : > { %p1481_p10 = por %p1480_p6, %p1479_p13 }
  0x4d   : > { %p1477_p2 = pneg %p1476_p1 }
  0x4e   : > { %p1483_p7 = por %p1482_p3, %p1481_p10 }
  0x50   : > { %p1484_p9 = pnand %p1483_p7, %p1477_p2 }
  0x52   : > { %1487 = shalt.err (!%p1484_p9)
}
  0x53   : > { %s1488_s30 = scalar_lea.vmem %s1756_s28, 128  ;;  %s1579_s11 = smov [#allocation2]  }
  0x54   : > { %p1489_p12 = scmp.ne.s32.totalorder %s1756_s28, %s1488_s30  ;;  %s1493_s17 = sshll.u32 %s1579_s11, 4  ;;  %s1494_s17 = int_to_ptr.vmem [resolvable:$false] %s1493_s17 }
  0x55   : > { %s1495_s7 = scalar_lea.vmem %s1494_s17, 256  ;;  %p1496_p4 = scmp.lt.s32.totalorder %s1756_s28, %s1494_s17 }
  0x56   : > { %p1491_p1 = pnand %p1489_p12, %p1475_p0  ;;  %p1497_p13 = scmp.lt.s32.totalorder %s1495_s7, %s1488_s30 }
  0x58   : > { %p1492_p5 = pneg %p1491_p1  ;;  %p1498_p6 = por %p1497_p13, %p1496_p4 }
  0x5a   : > { %p1499_p10 = pnand %p1498_p6, %p1492_p5 }
  0x5c   : > { %1502 = shalt.err (!%p1499_p10)
}
  0x5d   : > { %1313 = dma.hbm_to_vmem [thread:$0]  (!%p1758_p11), %s1754_s10, 128, %s1756_s28, %s1762_s13, %s1577_s15, %s1577_s15, %s1578_s16  }
  0x5e   : > { %231 = sbr.rel (%p1655_p8) target bundleno = 722 (0x2d2), region = 40  ;;  %s1796_s14 = sand.u32 (!%p1655_p8), 1, %s1565_s19  }
  0x5f   : > { %s1100_s6 = sshll.u32 (!%p1655_p8), %s1796_s14, 3  ;;  %s234_s8 = scalar_lea.sflag (!%p1655_p8), [#allocation3], %s1796_s14 }
  0x60   : > { %s237_s9 = scalar_lea.vmem (!%p1655_p8), [#allocation2], %s1100_s6  ;;  %p1955_p4 = scmp.ne.s32.totalorder (!%p1655_p8), %s1948_s24, 0 }
  0x65   : > { %1548 = dma.done.wait (%p1955_p4), %s234_s8, 128  }
  0x66   : > { %1550 = vsyncadd (%p1955_p4), %s234_s8, 4294967168  ;;  %p1956_p5 = scmp.eq.s32.totalorder %s1636_s22, 0 }
  0x68   : > { %1552 = dma.done.wait (%p1956_p5), [#allocation6], 4608   ;;  %p1957_p11 = pmov %p1956_p5 }
  0x69   : > { %v1580_v0 = vmov 0.0   ;;  %vm1581_vm0 = vmmov 0   ;;  %v1364_v1 = vld [vmem:[#allocation5 + $0x20] sm:$0xff]   ;;  %v1366_v3 = vld [vmem:[#allocation5 + $0x28] sm:$0xff]   ;;  %vm291_vm1 = vsmask.f32 256 }
  0x6a   : > { %1554 = vsyncadd (%p1957_p11), [#allocation6], 4294962688  ;;  %1195 = vmatprep.subr.bf16.mxu0 %v1580_v0  ;;  %1207 = vmatprep.subr.bf16.mxu1 %v1580_v0  ;;  %v1365_v2 = vld [vmem:[#allocation5] sm:$0xff]   ;;  %v1367_v4 = vld [vmem:[#allocation5 + $0x8] sm:$0xff]   ;;  %vm290_vm2 = vcmask 1040384   ;;  %vm336_vm3 = vcmask 523264  }
  0x6b   : > { %1203 = vmatprep.mubr.msk.bf16.mxu0 %vm1581_vm0, %v1580_v0  ;;  %1215 = vmatprep.mubr.msk.bf16.mxu1 %vm1581_vm0, %v1580_v0  ;;  %v1368_v5 = vld [vmem:[#allocation5 + $0x30] sm:$0xff]   ;;  %v1370_v8 = vld [vmem:[#allocation5 + $0x38] sm:$0xff]   ;;  %vm1821_vm4 = vmand %vm290_vm2, %vm291_vm1  ;;  %vm459_vm5 = vcmask 1046528   ;;  %s1103_s10 = sshll.u32 %s1796_s14, 4  ;;  %s1152_s28 = sshll.u32 %s1636_s22, 8 }
  0x6c   : > { %1196 = vmatpush3.bf16.msra.mxu0 %v1364_v1  ;;  %1208 = vmatpush3.bf16.msra.mxu1 %v1365_v2  ;;  %v1369_v6 = vld [vmem:[#allocation5 + $0x10] sm:$0xff]   ;;  %v1371_v11 = vld [vmem:[#allocation5 + $0x18] sm:$0xff]   ;;  %v1373_v16 = vld [vmem:[#allocation5 + $0x40] sm:$0xff]   ;;  %s271_s12 = scalar_lea.vmem [#allocation8], %s1103_s10  ;;  %s1893_s17 = scalar_lea.hbm %s1944_s5, %s1152_s28 }
  0x6d   : > { %1197 = vmatprep.subr.bf16.mxu0 %v1580_v0  ;;  %1209 = vmatprep.subr.bf16.mxu1 %v1580_v0  ;;  %v1372_v7 = vld [vmem:[%s237_s9] sm:$0xff]   ;;  %v1374_v18 = vld [vmem:[#allocation5 + $0x48] sm:$0xff]   ;;  %v1377_v24 = vld [vmem:[#allocation7 + $0x40] sm:$0xff]   ;;  %s999_s13 = sshll.u32 %s271_s12, 4  ;;  %s986_s7 = scalar_lea.sflag [#allocation4], %s1796_s14  ;;  %s1895_s13 = int_to_ptr.vmem [resolvable:$true] %s999_s13 }
  0x6e   : > { %v282_v9 = vshrl.u32 %v1372_v7, 16  ;;  %v285_v10 = vshll.u32 %v1372_v7, 16  ;;  %v1375_v21 = vld [vmem:[#allocation5 + $0x50] sm:$0xff]   ;;  %v1376_v22 = vld [vmem:[#allocation5 + $0x58] sm:$0xff]   ;;  %v1378_v25 = vld [vmem:[#allocation7 + $0x48] sm:$0xff]   ;;  %s1503_s22 = scalar_lea.vmem %s1895_s13, 256 }
  0x6f   : > { %v1379_v26 = vld [vmem:[#allocation7 + $0x50] sm:$0xff]   ;;  %v1380_v27 = vld [vmem:[#allocation7] sm:$0xff]   ;;  %v1381_v28 = vld [vmem:[#allocation7 + $0x58] sm:$0xff]   ;;  %p1504_p8 = scmp.ne.s32.totalorder %s1895_s13, %s1503_s22  ;;  %p1960_p0 = scmp.ne.s32.totalorder %s1953_s23, 0 }
  0x70   : > { %1198 = vmatpush3.bf16.msra.mxu0 %v1366_v3  ;;  %1210 = vmatpush3.bf16.msra.mxu1 %v1367_v4  ;;  %v284_v12 = vrot.slane %v282_v9, 7  ;;  %v1382_v29 = vld [vmem:[#allocation7 + $0x8] sm:$0xff]   ;;  %v1383_v30 = vld [vmem:[#allocation7 + $0x60] sm:$0xff]   ;;  %v1384_v31 = vld [vmem:[#allocation7 + $0x10] sm:$0xff]   ;;  %s1582_s6 = smov [#allocation8]  }
  0x71   : > { %1199 = vmatprep.subr.bf16.mxu0 %v1580_v0  ;;  %1211 = vmatprep.subr.bf16.mxu1 %v1580_v0  ;;  %v1385_v32 = vld [vmem:[#allocation7 + $0x68] sm:$0xff]   ;;  %v1386_v33 = vld [vmem:[#allocation7 + $0x18] sm:$0xff]   ;;  %v1387_v34 = vld [vmem:[#allocation7 + $0x70] sm:$0xff]   ;;  %p1505_p2 = pnand %p1504_p8, %p1960_p0  ;;  %s1507_s8 = sshll.u32 %s1582_s6, 4  ;;  %s1508_s8 = int_to_ptr.vmem [resolvable:$false] %s1507_s8 }
  0x72   : > { %v287_v14 = vor.u32 %v285_v10, %v284_v12  ;;  %v294_v15 = vsel %vm1821_vm4, %v284_v12, 0  ;;  %v1388_v35 = vld [vmem:[#allocation7 + $0x20] sm:$0xff]   ;;  %v1389_v36 = vld [vmem:[#allocation7 + $0x78] sm:$0xff]   ;;  %v1390_v37 = vld [vmem:[#allocation7 + $0x28] sm:$0xff]   ;;  %s1509_s9 = scalar_lea.vmem %s1508_s8, 512  ;;  %p1510_p7 = scmp.lt.s32.totalorder %s1895_s13, %s1508_s8 }
  0x73   : > { %v461_v20 = vrot.slane %v294_v15, 1  ;;  %v1391_v38 = vld [vmem:[#allocation7 + $0x30] sm:$0xff]   ;;  %v1393_v39 = vld [vmem:[#allocation7 + $0x38] sm:$0xff]   ;;  %p1506_p3 = pneg %p1505_p2  ;;  %p1511_p9 = scmp.lt.s32.totalorder %s1509_s9, %s1503_s22 }
  0x74   : > { %1200 = vmatpush3.bf16.msra.mxu0 %v1368_v5  ;;  %1212 = vmatpush3.bf16.msra.mxu1 %v1369_v6  ;;  %v293_v17 = vsel %vm1821_vm4, 0, %v287_v14  ;;  %v1120_v50 = vld [vmem:[%s1941_s2] ss:$0 sm:$0xff] }
  0x75   : > { %1201 = vmatprep.subr.bf16.mxu0 %v1580_v0  ;;  %1213 = vmatprep.subr.bf16.mxu1 %v1580_v0  ;;  %v460_v19 = vrot.slane %v293_v17, 1  ;;  %p1512_p12 = por %p1511_p9, %p1510_p7 }
  0x77   : > { %v462_v23 = vsel %vm459_vm5, %v460_v19, %v461_v20  ;;  %p1513_p1 = pnand %p1512_p12, %p1506_p3 }
  0x78   : > { %1202 = vmatpush3.bf16.msra.mxu0 %v1370_v8  ;;  %1214 = vmatpush3.bf16.msra.mxu1 %v1371_v11 }
  0x79   : > { %1219 = vmatprep.subr.bf16.mxu0 %v1580_v0  ;;  %1231 = vmatprep.subr.bf16.mxu1 %v1580_v0 }
  0x7b   : > { %1204 = vmatmul.mubr.msk.bf16.vlgmr.msra.gmra.mrb[0].mxu0 %vm336_vm3, %v1372_v7  ;;  %1216 = vmatmul.mubr.msk.bf16.vlgmr.msra.gmra.mrb[0].mxu1 %vm336_vm3, %v293_v17 }
  0x7c   : > { %1220 = vmatpush3.bf16.msra.mxu0 %v1373_v16  ;;  %1227 = vmatprep.mubr.msk.bf16.mxu0 %vm1581_vm0, %v1580_v0 }
  0x7d   : > { %1221 = vmatprep.subr.bf16.mxu0 %v1580_v0  ;;  %1247 = vmatprep.mubr.msk.bf16.mxu1 %vm1581_vm0, %v1580_v0 }
  0x7e   : > { %1232 = vmatpush3.bf16.msra.mxu1 %v1377_v24 }
  0x7f   : > { %1233 = vmatprep.subr.bf16.mxu1 %v1580_v0 }
  0x80   : > { %1222 = vmatpush3.bf16.msra.mxu0 %v1374_v18 }
  0x81   : > { %1223 = vmatprep.subr.bf16.mxu0 %v1580_v0 }
  0x82   : > { %1234 = vmatpush3.bf16.msra.mxu1 %v1378_v25 }
  0x83   : > { %1235 = vmatprep.subr.bf16.mxu1 %v1580_v0 }
  0x84   : > { %1224 = vmatpush3.bf16.msra.mxu0 %v1375_v21 }
  0x85   : > { %1225 = vmatprep.subr.bf16.mxu0 %v1580_v0 }
  0x86   : > { %1236 = vmatpush3.bf16.msra.mxu1 %v1379_v26 }
  0x87   : > { %1237 = vmatprep.subr.bf16.mxu1 %v1580_v0 }
  0x88   : > { %1226 = vmatpush3.bf16.msra.mxu0 %v1376_v22 }
  0x89   : > { %1251 = vmatprep.subr.bf16.mxu0 %v1580_v0 }
  0x8a   : > { %1238 = vmatpush3.bf16.msra.mxu1 %v1381_v28 }
  0x8b   : > { %1228 = vmatmul.mubr.msk.bf16.vlgmr.msra.gmra.mrb[4].mxu0 %vm336_vm3, %v462_v23  ;;  %1239 = vmatprep.subr.bf16.mxu1 %v1580_v0 }
  0x8c   : > { %1267 = vmatprep.mubr.msk.bf16.mxu0 %vm1581_vm0, %v1580_v0  ;;  %1252 = vmatpush3.bf16.msra.mxu0 %v1380_v27 }
  0x8d   : > { %1253 = vmatprep.subr.bf16.mxu0 %v1580_v0 }
  0x8e   : > { %1240 = vmatpush3.bf16.msra.mxu1 %v1383_v30 }
  0x8f   : > { %1241 = vmatprep.subr.bf16.mxu1 %v1580_v0 }
  0x90   : > { %1254 = vmatpush3.bf16.msra.mxu0 %v1382_v29 }
  0x91   : > { %1255 = vmatprep.subr.bf16.mxu0 %v1580_v0 }
  0x92   : > { %1242 = vmatpush3.bf16.msra.mxu1 %v1385_v32 }
  0x93   : > { %1243 = vmatprep.subr.bf16.mxu1 %v1580_v0 }
  0x94   : > { %1256 = vmatpush3.bf16.msra.mxu0 %v1384_v31 }
  0x95   : > { %1257 = vmatprep.subr.bf16.mxu0 %v1580_v0 }
  0x96   : > { %1244 = vmatpush3.bf16.msra.mxu1 %v1387_v34 }
  0x97   : > { %1245 = vmatprep.subr.bf16.mxu1 %v1580_v0 }
  0x98   : > { %1258 = vmatpush3.bf16.msra.mxu0 %v1386_v33 }
  0x99   : > { %1259 = vmatprep.subr.bf16.mxu0 %v1580_v0 }
  0x9a   : > { %1246 = vmatpush3.bf16.msra.mxu1 %v1389_v36 }
  0x9b   : > { %1271 = vmatprep.subr.bf16.mxu1 %v1580_v0 }
  0x9c   : > { %1260 = vmatpush3.bf16.msra.mxu0 %v1388_v35 }
  0x9d   : > { %1261 = vmatprep.subr.bf16.mxu0 %v1580_v0 }
  0xa0   : > { %1262 = vmatpush3.bf16.msra.mxu0 %v1390_v37 }
  0xa1   : > { %1263 = vmatprep.subr.bf16.mxu0 %v1580_v0 }
  0xa4   : > { %1264 = vmatpush3.bf16.msra.mxu0 %v1391_v38 }
  0xa5   : > { %1265 = vmatprep.subr.bf16.mxu0 %v1580_v0 }
  0xa8   : > { %1266 = vmatpush3.bf16.msra.mxu0 %v1393_v39 }
 0x14e   : > { %v373_v40 = vpop.f32.mrb[0].mxu0  ;;  %v441_v41 = vpop.f32.mrb[0].mxu1 }
 0x14f   : > { %v1205_v42 = vpop.f32.mrb[1].mxu0  ;;  %v442_v43 = vadd.f32 %v441_v41, %v373_v40  ;;  %v1217_v44 = vpop.f32.mrb[1].mxu1 }
 0x150   : > { %v376_v45 = vpop.f32.mrb[2].mxu0  ;;  %v444_v46 = vpop.f32.mrb[2].mxu1 }
 0x151   : > { %v1206_v47 = vpop.f32.mrb[3].mxu0  ;;  %v445_v48 = vadd.f32 %v444_v46, %v376_v45  ;;  %v1218_v49 = vpop.f32.mrb[3].mxu1  ;;  %v1394_v46 = vld [vmem:[#allocation7 + $0x88] sm:$0xff]  }
 0x15e   : > { %v524_v51 = vpop.f32.mrb[4].mxu0 }
 0x15f   : > { %v531_v52 = vadd.f32 %v524_v51, %v442_v43  ;;  %v1229_v53 = vpop.f32.mrb[5].mxu0  ;;  %v1392_v43 = vld [vmem:[#allocation7 + $0x80] sm:$0xff]  }
 0x160   : > { %v527_v54 = vpop.f32.mrb[6].mxu0  ;;  %v1397_v53 = vld [vmem:[#allocation7 + $0xa0] sm:$0xff]  }
 0x161   : > { %v539_v55 = vadd.f32 %v1120_v50, %v531_v52  ;;  %v532_v56 = vadd.f32 %v527_v54, %v445_v48  ;;  %v1230_v57 = vpop.f32.mrb[7].mxu0  ;;  %v1396_v52 = vld [vmem:[#allocation7 + $0x98] sm:$0xff]   ;;  %v1398_v54 = vld [vmem:[#allocation7 + $0xa8] sm:$0xff]  }
 0x163   : > { %v541_v58 = vand.u32 2147483647, %v539_v55  ;;  %v540_v59 = vadd.f32 %v1120_v50, %v532_v56  ;;  %v1395_v50 = vld [vmem:[#allocation7 + $0x90] sm:$0xff]   ;;  %v1400_v56 = vld [vmem:[#allocation7 + $0xb8] sm:$0xff]  }
 0x165   : > { %v543_v60 = vmul.f32 0.70710677, %v541_v58  ;;  %v542_v61 = vand.u32 2147483647, %v540_v59 }
 0x167   : > { %v545_v62 = vmul.f32 0.3275911, %v543_v60  ;;  %v544_v63 = vmul.f32 0.70710677, %v542_v61  ;;  %v569_v4 = vsub.f32 0.0, %v543_v60 }
 0x169   : > { %v547_v1 = vadd.f32 1.0, %v545_v62  ;;  %v546_v2 = vmul.f32 0.3275911, %v544_v63  ;;  %v570_v5 = vsub.f32 0.0, %v544_v63  ;;  %v571_v7 = vmul.f32 %v569_v4, %v543_v60 }
 0x16b   : > { %1401 = vrcp.f32 %v547_v1  ;;  %v548_v3 = vadd.f32 1.0, %v546_v2  ;;  %v572_v11 = vmul.f32 %v570_v5, %v544_v63  ;;  %v573_v12 = vmul.f32 1.442695, %v571_v7 }
 0x16d   : > { %1403 = vrcp.f32 %v548_v3  ;;  %v575_v18 = vmul.f32 1.442695, %v572_v11 }
 0x16e   : > { %1405 = vpow2.f32 %v573_v12 }
 0x16f   : > { %1407 = vpow2.f32 %v575_v18 }
 0x175   : > { %v1402_v6 = vpop.eup %1401 }
 0x176   : > { %v551_v8 = vmul.f32 1.0614054, %v1402_v6 }
 0x177   : > { %v1404_v9 = vpop.eup %1403 }
 0x178   : > { %v553_v10 = vadd.f32 -1.4531521, %v551_v8  ;;  %v552_v14 = vmul.f32 1.0614054, %v1404_v9  ;;  %v1406_v29 = vpop.eup %1405 }
 0x179   : > { %v1408_v33 = vpop.eup %1407 }
 0x17a   : > { %v555_v15 = vmul.f32 %v1402_v6, %v553_v10  ;;  %v554_v16 = vadd.f32 -1.4531521, %v552_v14 }
 0x17c   : > { %v557_v17 = vadd.f32 1.4214138, %v555_v15  ;;  %v556_v19 = vmul.f32 %v1404_v9, %v554_v16 }
 0x17e   : > { %v559_v20 = vmul.f32 %v1402_v6, %v557_v17  ;;  %v558_v21 = vadd.f32 1.4214138, %v556_v19 }
 0x180   : > { %v561_v22 = vadd.f32 -0.28449672, %v559_v20  ;;  %v560_v23 = vmul.f32 %v1404_v9, %v558_v21 }
 0x182   : > { %v563_v24 = vmul.f32 %v1402_v6, %v561_v22  ;;  %v562_v25 = vadd.f32 -0.28449672, %v560_v23 }
 0x184   : > { %v565_v26 = vadd.f32 0.2548296, %v563_v24  ;;  %v564_v27 = vmul.f32 %v1404_v9, %v562_v25 }
 0x186   : > { %v567_v28 = vmul.f32 %v1402_v6, %v565_v26  ;;  %v566_v30 = vadd.f32 0.2548296, %v564_v27 }
 0x188   : > { %v577_v31 = vmul.f32 %v1406_v29, %v567_v28  ;;  %v568_v32 = vmul.f32 %v1404_v9, %v566_v30 }
 0x18a   : > { %v579_v34 = vsub.f32 1.0, %v577_v31  ;;  %v578_v35 = vmul.f32 %v1408_v33, %v568_v32 }
 0x18c   : > { %v581_v36 = vmul.f32 %v579_v34, %v541_v58  ;;  %v580_v37 = vsub.f32 1.0, %v578_v35 }
 0x18e   : > { %v583_v38 = vadd.f32 %v581_v36, %v539_v55  ;;  %v582_v39 = vmul.f32 %v580_v37, %v542_v61  ;;  %v1399_v55 = vld [vmem:[#allocation7 + $0xb0] sm:$0xff]  }
 0x190   : > { %v584_v40 = vadd.f32 %v582_v39, %v540_v59  ;;  %v1863_v41 = vmul.f32 0.5, %v583_v38 }
 0x192   : > { %v1865_v42 = vmul.f32 0.5, %v584_v40 }
 0x194   : > { %v587_v44 = vpack.c.bf16 %v1865_v42, %v1863_v41 }
 0x196   : > { %1248 = vmatmul.mubr.bf16.vlgmr.msra.gmra.mrb[4].mxu1 %v587_v44  ;;  %v590_v45 = vshrl.u32 %v587_v44, 16  ;;  %v593_v48 = vshll.u32 %v587_v44, 16 }
 0x197   : > { %1272 = vmatpush3.bf16.msra.mxu1 %v1392_v43  ;;  %1287 = vmatprep.mubr.msk.bf16.mxu1 %vm1581_vm0, %v1580_v0 }
 0x198   : > { %1273 = vmatprep.subr.bf16.mxu1 %v1580_v0  ;;  %v592_v47 = vrot.slane %v590_v45, 7 }
 0x19a   : > { %v595_v49 = vor.u32 %v593_v48, %v592_v47  ;;  %v599_v57 = vsel %vm1821_vm4, %v592_v47, 0 }
 0x19b   : > { %1274 = vmatpush3.bf16.msra.mxu1 %v1394_v46  ;;  %v831_v59 = vrot.slane %v599_v57, 1 }
 0x19c   : > { %v598_v51 = vsel %vm1821_vm4, 0, %v595_v49  ;;  %1275 = vmatprep.subr.bf16.mxu1 %v1580_v0 }
 0x19d   : > { %1268 = vmatmul.mubr.bf16.vlgmr.msra.gmra.mrb[8].mxu0 %v598_v51  ;;  %v830_v58 = vrot.slane %v598_v51, 1 }
 0x19f   : > { %1276 = vmatpush3.bf16.msra.mxu1 %v1395_v50  ;;  %v832_v60 = vsel %vm459_vm5, %v830_v58, %v831_v59 }
 0x1a0   : > { %1277 = vmatprep.subr.bf16.mxu1 %v1580_v0 }
 0x1a3   : > { %1278 = vmatpush3.bf16.msra.mxu1 %v1396_v52 }
 0x1a4   : > { %1279 = vmatprep.subr.bf16.mxu1 %v1580_v0 }
 0x1a7   : > { %1280 = vmatpush3.bf16.msra.mxu1 %v1397_v53 }
 0x1a8   : > { %1281 = vmatprep.subr.bf16.mxu1 %v1580_v0 }
 0x1ab   : > { %1282 = vmatpush3.bf16.msra.mxu1 %v1398_v54 }
 0x1ac   : > { %1283 = vmatprep.subr.bf16.mxu1 %v1580_v0 }
 0x1af   : > { %1284 = vmatpush3.bf16.msra.mxu1 %v1399_v55 }
 0x1b0   : > { %1285 = vmatprep.subr.bf16.mxu1 %v1580_v0  ;;  %v1145_v0 = vld [vmem:[%s1943_s4] ss:$0 sm:$0xff] }
 0x1b3   : > { %1286 = vmatpush3.bf16.msra.mxu1 %v1400_v56 }
 0x1b6   : > { %1288 = vmatmul.mubr.bf16.vlgmr.msra.gmra.mrb[8].mxu1 %v832_v60 }
 0x269   : > { %v715_v61 = vpop.f32.mrb[4].mxu1 }
 0x26a   : > { %v1249_v62 = vpop.f32.mrb[5].mxu1 }
 0x26b   : > { %v718_v63 = vpop.f32.mrb[6].mxu1 }
 0x26c   : > { %v1250_v1 = vpop.f32.mrb[7].mxu1 }
 0x270   : > { %v804_v2 = vpop.f32.mrb[8].mxu0 }
 0x271   : > { %v805_v3 = vadd.f32 %v804_v2, %v715_v61  ;;  %v1269_v4 = vpop.f32.mrb[9].mxu0 }
 0x272   : > { %v807_v5 = vpop.f32.mrb[10].mxu0 }
 0x273   : > { %v808_v6 = vadd.f32 %v807_v5, %v718_v63  ;;  %v1270_v7 = vpop.f32.mrb[11].mxu0 }
 0x289   : > { %v916_v13 = vpop.f32.mrb[8].mxu1 }
 0x28a   : > { %v923_v8 = vadd.f32 %v916_v13, %v805_v3  ;;  %v1289_v9 = vpop.f32.mrb[9].mxu1 }
 0x28b   : > { %v919_v10 = vpop.f32.mrb[10].mxu1 }
 0x28c   : > { %v931_v11 = vadd.f32 %v1145_v0, %v923_v8  ;;  %v924_v12 = vadd.f32 %v919_v10, %v808_v6  ;;  %v1290_v14 = vpop.f32.mrb[11].mxu1 }
 0x28e   : > { %v933_v15 = vand.u32 2147483647, %v931_v11  ;;  %v932_v16 = vadd.f32 %v1145_v0, %v924_v12 }
 0x290   : > { %v935_v17 = vmul.f32 0.70710677, %v933_v15  ;;  %v934_v18 = vand.u32 2147483647, %v932_v16 }
 0x292   : > { %v937_v19 = vmul.f32 0.3275911, %v935_v17  ;;  %v936_v20 = vmul.f32 0.70710677, %v934_v18  ;;  %v961_v24 = vsub.f32 0.0, %v935_v17 }
 0x294   : > { %v939_v21 = vadd.f32 1.0, %v937_v19  ;;  %v938_v22 = vmul.f32 0.3275911, %v936_v20  ;;  %v962_v25 = vsub.f32 0.0, %v936_v20  ;;  %v963_v27 = vmul.f32 %v961_v24, %v935_v17 }
 0x296   : > { %1409 = vrcp.f32 %v939_v21  ;;  %v940_v23 = vadd.f32 1.0, %v938_v22  ;;  %v964_v31 = vmul.f32 %v962_v25, %v936_v20  ;;  %v965_v32 = vmul.f32 1.442695, %v963_v27 }
 0x298   : > { %1411 = vrcp.f32 %v940_v23  ;;  %v967_v37 = vmul.f32 1.442695, %v964_v31 }
 0x299   : > { %1413 = vpow2.f32 %v965_v32 }
 0x29a   : > { %1415 = vpow2.f32 %v967_v37 }
 0x2a0   : > { %v1410_v26 = vpop.eup %1409 }
 0x2a1   : > { %v943_v28 = vmul.f32 1.0614054, %v1410_v26 }
 0x2a2   : > { %v1412_v29 = vpop.eup %1411 }
 0x2a3   : > { %v945_v30 = vadd.f32 -1.4531521, %v943_v28  ;;  %v944_v33 = vmul.f32 1.0614054, %v1412_v29  ;;  %v1414_v50 = vpop.eup %1413 }
 0x2a4   : > { %v1416_v54 = vpop.eup %1415 }
 0x2a5   : > { %v947_v34 = vmul.f32 %v1410_v26, %v945_v30  ;;  %v946_v35 = vadd.f32 -1.4531521, %v944_v33 }
 0x2a7   : > { %v949_v36 = vadd.f32 1.4214138, %v947_v34  ;;  %v948_v38 = vmul.f32 %v1412_v29, %v946_v35 }
 0x2a9   : > { %v951_v39 = vmul.f32 %v1410_v26, %v949_v36  ;;  %v950_v40 = vadd.f32 1.4214138, %v948_v38 }
 0x2ab   : > { %v953_v43 = vadd.f32 -0.28449672, %v951_v39  ;;  %v952_v44 = vmul.f32 %v1412_v29, %v950_v40 }
 0x2ad   : > { %v955_v45 = vmul.f32 %v1410_v26, %v953_v43  ;;  %v954_v46 = vadd.f32 -0.28449672, %v952_v44 }
 0x2af   : > { %v957_v47 = vadd.f32 0.2548296, %v955_v45  ;;  %v956_v48 = vmul.f32 %v1412_v29, %v954_v46 }
 0x2b1   : > { %v959_v49 = vmul.f32 %v1410_v26, %v957_v47  ;;  %v958_v51 = vadd.f32 0.2548296, %v956_v48 }
 0x2b3   : > { %v969_v52 = vmul.f32 %v1414_v50, %v959_v49  ;;  %v960_v53 = vmul.f32 %v1412_v29, %v958_v51 }
 0x2b5   : > { %v971_v55 = vsub.f32 1.0, %v969_v52  ;;  %v970_v56 = vmul.f32 %v1416_v54, %v960_v53 }
 0x2b7   : > { %v973_v57 = vmul.f32 %v971_v55, %v933_v15  ;;  %v972_v58 = vsub.f32 1.0, %v970_v56 }
 0x2b9   : > { %v975_v59 = vadd.f32 %v973_v57, %v931_v11  ;;  %v974_v60 = vmul.f32 %v972_v58, %v934_v18 }
 0x2bb   : > { %v977_v61 = vmul.f32 0.5, %v975_v59  ;;  %v976_v62 = vadd.f32 %v974_v60, %v932_v16 }
 0x2bd   : > { %v979_v63 = vadd.f32 %v977_v61, %v1863_v41  ;;  %v978_v1 = vmul.f32 0.5, %v976_v62 }
 0x2bf   : > { %v981_v2 = vmul.f32 0.70710677, %v979_v63  ;;  %v980_v3 = vadd.f32 %v978_v1, %v1865_v42 }
 0x2c1   : > { %983 = vst [vmem:[%s271_s12] sm:$0xff] %v981_v2  ;;  %v982_v4 = vmul.f32 0.70710677, %v980_v3 }
 0x2c3   : > { %984 = vst [vmem:[%s271_s12 + $0x8] sm:$0xff] %v982_v4 }
 0x2c4   : > { %1516 = shalt.err (!%p1513_p1)
}
 0x2c5   : > { %s1517_s24 = scalar_lea.hbm %s1893_s17, 256  ;;  %s1521_s16 = scalar_lea.hbm %s1944_s5, 512 }
 0x2c6   : > { %p1518_p13 = scmp.ne.s32.totalorder %s1893_s17, %s1517_s24  ;;  %p1522_p4 = scmp.lt.u32.totalorder %s1893_s17, %s1944_s5 }
 0x2c7   : > { %p1523_p5 = scmp.lt.u32.totalorder %s1521_s16, %s1517_s24  ;;  %p1525_p8 = scmp.lt.u32.totalorder %s1517_s24, %s1893_s17 }
 0x2c8   : > { %p1519_p6 = pnand %p1518_p13, %p1960_p0 }
 0x2c9   : > { %p1524_p11 = por %p1523_p5, %p1522_p4 }
 0x2ca   : > { %p1520_p10 = pneg %p1519_p6 }
 0x2cb   : > { %p1526_p2 = por %p1525_p8, %p1524_p11 }
 0x2cd   : > { %p1527_p3 = pnand %p1526_p2, %p1520_p10 }
 0x2cf   : > { %1530 = shalt.err (!%p1527_p3)
}
 0x2d0   : > { %s1583_s12 = smov 128   ;;  %s1584_s30 = smov 8  }
 0x2d1   : > { %1301 = dma.vmem_to_hbm [thread:$0]  (%p1960_p0), %s1895_s13, 256, %s1893_s17, %s986_s7, %s1583_s12, %s1583_s12, %s1584_s30  }
 0x2d2 PF: > { %s1014_s11 = sand.u32 1, %s1561_s18   ;;  %p1961_p7 = scmp.ne.s32.totalorder %s1949_s25, 0 }
 0x2d3   : > { %p1962_p9 = scmp.ge.s32.totalorder %s1573_s21, 2  ;;  %s1015_s22 = scalar_lea.sflag [#allocation4], %s1014_s11 }
 0x2d5   : > { %p1315_p12 = pnand %p1962_p9, %p1961_p7 }
 0x2d7   : > { %1556 = dma.done.wait (!%p1315_p12), %s1015_s22, 256  }
 0x2d8   : > { %1558 = vsyncadd (!%p1315_p12), %s1015_s22, 4294967040  ;;  %p19_p1 = scmp.ge.s32.totalorder %s1731_s29, 4   ;;  %s1963_s18 = smov %s1565_s19 }
 0x2d9   : > { %s1964_s19 = smov %s1569_s20  ;;  %s1965_s20 = smov %s1747_s27 }
 0x2da   : > { %s1966_s21 = smov %s1731_s29  ;;  %21 = sbr.rel (!%p19_p1) target bundleno = 6 (0x6), region = 97 }
 0x2e1   :  { %1020 = vsyncpa [#allocation3], 1 }
 0x2e2   :  { %1022 = vsyncpa [#allocation3 + $0x1], 1 }
 0x2e3   :  { %1023 = vsyncpa [#allocation6], 1 }
 0x2e4   :  { %1024 = vsyncpa [#allocation4], 1 }
 0x2e5   :  { %1026 = vsyncpa [#allocation4 + $0x1], 1 }

</bundles_post_ra>
